<compile_context>
chip_gen: v5e
topology: v5e:2x2
jax: 0.10.0
libtpu: 0.0.40
codegen_flags: <defaults>
</compile_context>

<pallas_src>
import functools

import jax
import jax.numpy as jnp
from jax import lax
from jax.experimental import pallas as pl
from jax.experimental.pallas import tpu as pltpu


def _round_up(a, b):
    return (a + b - 1) // b * b


def _default_vmem_limit_bytes():
    cap = 128 << 20
    try:
        info = pltpu.get_tpu_info()
        cap = int(getattr(info, "vmem_capacity_bytes", cap))
    except Exception:
        pass
    # ~12% headroom below physical VMEM, never above 100 MiB (=> 56 MiB on v7x).
    return min(100 << 20, cap * 7 // 8)


@functools.lru_cache(maxsize=1)
def _supports_single_buffering():
    """Probe whether pipeline_mode=pl.Buffered(1) is accepted by pallas_call."""
    try:
        mode = pl.Buffered(1)

        def _probe(x_ref, o_ref):
            o_ref[...] = x_ref[...] * 2.0

        x = jnp.ones((8, 128), jnp.float32)
        out = pl.pallas_call(
            _probe,
            out_shape=jax.ShapeDtypeStruct((16, 128), jnp.float32),
            grid=(2,),
            in_specs=[pl.BlockSpec((8, 128), lambda i: (0, 0), pipeline_mode=mode)],
            out_specs=pl.BlockSpec((8, 128), lambda i: (i, 0)),
        )(x)
        jax.block_until_ready(out)
        return True
    except Exception:
        return False


def _layer_norm_f32(y, gamma, beta, eps):
    mean = jnp.mean(y, axis=-1, keepdims=True)
    cent = y - mean
    var = jnp.mean(cent * cent, axis=-1, keepdims=True)
    return cent * lax.rsqrt(var + eps) * gamma + beta


def _ff_kernel_resident(x_ref, w1_ref, b1_ref, w2_ref, b2_ref, g_ref, beta_ref,
                        o_ref, *, eps, pre_lnorm, compute_dtype):
    """Grid: (row_tiles,). W1/W2 fully VMEM-resident; no reduction axis, no scratch."""
    x = x_ref[...]
    xf = x.astype(jnp.float32)
    gamma = g_ref[...].astype(jnp.float32)
    beta = beta_ref[...].astype(jnp.float32)

    if pre_lnorm:
        cin = _layer_norm_f32(xf, gamma, beta, eps).astype(compute_dtype)
    else:
        cin = x.astype(compute_dtype)

    # Linear1 + bias + ReLU (f32 accumulate on the MXU).
    h = jnp.dot(cin, w1_ref[...], preferred_element_type=jnp.float32)
    h = jnp.maximum(h + b1_ref[...].astype(jnp.float32), 0.0)
    # TODO(synk): dropout omitted (eval-mode identity); add PRNG masking for training semantics.

    # Linear2 + bias.
    core = jnp.dot(h.astype(compute_dtype), w2_ref[...],
                   preferred_element_type=jnp.float32)
    core = core + b2_ref[...].astype(jnp.float32)

    if pre_lnorm:
        out = core + xf
    else:
        out = _layer_norm_f32(xf + core, gamma, beta, eps)
    o_ref[...] = out.astype(o_ref.dtype)


def _ff_kernel_tiled(x_ref, w1_ref, b1_ref, w2_ref, b2_ref, g_ref, beta_ref,
                     o_ref, *scratch, eps, pre_lnorm, compute_dtype):
    """Grid: (row_tiles, d_inner_tiles). Axis 1 is the FFN-hidden reduction."""
    if pre_lnorm:
        cin_ref, acc_ref = scratch
    else:
        (acc_ref,) = scratch

    k = pl.program_id(1)
    nk = pl.num_programs(1)
    gamma = g_ref[...].astype(jnp.float32)
    beta = beta_ref[...].astype(jnp.float32)

    @pl.when(k == 0)
    def _init():
        acc_ref[...] = jnp.zeros_like(acc_ref)
        if pre_lnorm:
            cin_ref[...] = _layer_norm_f32(
                x_ref[...].astype(jnp.float32), gamma, beta, eps
            ).astype(cin_ref.dtype)

    cin = cin_ref[...] if pre_lnorm else x_ref[...].astype(compute_dtype)

    # Linear1 slice: (tr, d_model) @ (d_model, ti) -> f32, + bias, ReLU.
    h = jnp.dot(cin, w1_ref[...], preferred_element_type=jnp.float32)
    h = jnp.maximum(h + b1_ref[...].astype(jnp.float32), 0.0)
    # TODO(synk): dropout omitted (eval-mode identity); add PRNG masking for training semantics.

    # Linear2 partial: accumulate (tr, d_model) in f32 across d_inner slices.
    acc_ref[...] += jnp.dot(h.astype(compute_dtype), w2_ref[...],
                            preferred_element_type=jnp.float32)

    @pl.when(k == nk - 1)
    def _finalize():
        core = acc_ref[...] + b2_ref[...].astype(jnp.float32)
        xf = x_ref[...].astype(jnp.float32)
        if pre_lnorm:
            o_ref[...] = (core + xf).astype(o_ref.dtype)
        else:
            o_ref[...] = _layer_norm_f32(xf + core, gamma, beta, eps).astype(o_ref.dtype)


def positionwise_ff(inp, params, *, pre_lnorm=False, eps=1e-5,
                    tile_rows=None, tile_inner=None, mxu_bf16=False,
                    vmem_limit_bytes=None):
    """inp: (seq, batch, d_model). params: dict of w1,b1,w2,b2,gamma,beta.

    Weights are stored pre-transposed: w1 (d_model, d_inner), w2 (d_inner, d_model)."""
    seq, batch, d_model = inp.shape
    d_inner = params["w1"].shape[1]
    rows = seq * batch
    dtype = inp.dtype
    itemsize = jnp.dtype(dtype).itemsize
    sublane = 8 if itemsize >= 4 else 16

    # Optional bf16 MXU operands (throughput/precision tradeoff): cast weights
    # wrapper-side (halves weight HBM traffic + VMEM), activations in-kernel.
    if mxu_bf16 and jnp.dtype(params["w1"].dtype).itemsize > 2:
        w1 = params["w1"].astype(jnp.bfloat16)
        w2 = params["w2"].astype(jnp.bfloat16)
    else:
        w1, w2 = params["w1"], params["w2"]
    compute_dtype = w1.dtype
    w_itemsize = jnp.dtype(compute_dtype).itemsize
    c_itemsize = w_itemsize

    if vmem_limit_bytes is None:
        vmem_limit_bytes = _default_vmem_limit_bytes()
    budget = int(vmem_limit_bytes) * 85 // 100  # headroom for compiler temps

    single_buf = _supports_single_buffering()
    wbuf = 1 if single_buf else 2

    def resident_bytes(tr):
        b = 2 * d_model * d_inner * w_itemsize * wbuf      # W1 + W2 resident
        b += 2 * 2 * tr * d_model * itemsize               # x & out tiles (double-buffered)
        b += tr * d_inner * (4 + c_itemsize)               # h (f32) + cast copy
        b += 3 * tr * d_model * 4                          # xf / core / LN temps
        return b

    def tiled_bytes(tr, ti):
        b = 2 * 2 * tr * d_model * itemsize                # x & out tiles (double-buffered)
        b += 2 * 2 * d_model * ti * w_itemsize             # W1 & W2 slices (double-buffered)
        b += tr * d_model * 4                              # f32 accumulator scratch
        b += tr * ti * (4 + c_itemsize)                    # h temp + cast
        b += (tr * d_model * c_itemsize) if pre_lnorm else 0   # cin scratch
        b += 2 * tr * d_model * 4                          # finalize temps
        return b

    # ---- choose d_inner tiling (ti == d_inner -> weight-resident path) ----
    if tile_inner is not None:
        ti = min(int(tile_inner), d_inner)
        if ti < d_inner and not (d_inner % ti == 0 and ti % 128 == 0):
            ti = d_inner
    else:
        tr_probe = max(sublane, min(_round_up(int(tile_rows or 256), sublane),
                                    _round_up(rows, sublane)))
        if resident_bytes(tr_probe) <= budget:
            ti = d_inner                                    # weights stream from HBM once
        else:
            divisors = [c for c in (2048, 1024, 512, 256, 128)
                        if c < d_inner and d_inner % c == 0]
            if divisors:
                fitting = [c for c in divisors if tiled_bytes(512, c) <= budget]
                ti = fitting[0] if fitting else divisors[-1]
            else:
                ti = d_inner
    resident = (ti == d_inner)
    nk = d_inner // ti

    # ---- row tile ----
    if tile_rows is None:
        tr_target = 256 if resident else 512   # bigger tr when weights re-stream
    else:
        tr_target = int(tile_rows)
    tr = max(sublane, min(_round_up(tr_target, sublane), _round_up(rows, sublane)))
    # >=2 row tiles so the "parallel" axis can shard over both v7x TensorCores.
    if _round_up(rows, tr) // tr < 2 and rows > sublane:
        tr = max(sublane, _round_up((rows + 1) // 2, sublane))
    # Shrink the row tile if the plan would overflow the scoped VMEM budget.
    bytes_fn = (lambda t: resident_bytes(t)) if resident else (lambda t: tiled_bytes(t, ti))
    while tr > sublane and bytes_fn(tr) > budget:
        tr = max(sublane, _round_up(tr // 2, sublane))
    rows_p = _round_up(rows, tr)

    x2d = inp.reshape(rows, d_model)
    if rows_p != rows:
        x2d = jnp.pad(x2d, ((0, rows_p - rows), (0, 0)))

    # Lane-dense broadcastable bias / affine params.
    b1 = params["b1"].reshape(1, d_inner)
    b2 = params["b2"].reshape(1, d_model)
    gamma = params["gamma"].reshape(1, d_model)
    beta = params["beta"].reshape(1, d_model)

    inv_mode = pl.Buffered(1) if single_buf else None

    def inv_spec(shape, index_map):
        # Grid-invariant input: single-buffer it when supported (reclaims VMEM).
        if inv_mode is not None:
            return pl.BlockSpec(shape, index_map, pipeline_mode=inv_mode)
        return pl.BlockSpec(shape, index_map)

    if resident:
        kernel = functools.partial(_ff_kernel_resident, eps=eps,
                                   pre_lnorm=pre_lnorm, compute_dtype=compute_dtype)
        grid = (rows_p // tr,)
        in_specs = [
            pl.BlockSpec((tr, d_model), lambda i: (i, 0)),       # x tile
            inv_spec((d_model, d_inner), lambda i: (0, 0)),      # W1 (VMEM-resident)
            inv_spec((1, d_inner), lambda i: (0, 0)),            # b1
            inv_spec((d_inner, d_model), lambda i: (0, 0)),      # W2 (VMEM-resident)
            inv_spec((1, d_model), lambda i: (0, 0)),            # b2
            inv_spec((1, d_model), lambda i: (0, 0)),            # gamma
            inv_spec((1, d_model), lambda i: (0, 0)),            # beta
        ]
        out_specs = pl.BlockSpec((tr, d_model), lambda i: (i, 0))
        scratch_shapes = []
        dim_sem = ("parallel",)
    else:
        kernel = functools.partial(_ff_kernel_tiled, eps=eps,
                                   pre_lnorm=pre_lnorm, compute_dtype=compute_dtype)
        grid = (rows_p // tr, nk)
        in_specs = [
            pl.BlockSpec((tr, d_model), lambda i, k: (i, 0)),    # x tile (k-invariant)
            pl.BlockSpec((d_model, ti), lambda i, k: (0, k)),    # W1 slice
            pl.BlockSpec((1, ti), lambda i, k: (0, k)),          # b1 slice
            pl.BlockSpec((ti, d_model), lambda i, k: (k, 0)),    # W2 slice
            inv_spec((1, d_model), lambda i, k: (0, 0)),         # b2
            inv_spec((1, d_model), lambda i, k: (0, 0)),         # gamma
            inv_spec((1, d_model), lambda i, k: (0, 0)),         # beta
        ]
        out_specs = pl.BlockSpec((tr, d_model), lambda i, k: (i, 0))
        scratch_shapes = []
        if pre_lnorm:
            scratch_shapes.append(pltpu.VMEM((tr, d_model), compute_dtype))  # LN(x) operand
        scratch_shapes.append(pltpu.VMEM((tr, d_model), jnp.float32))        # f32 accumulator
        dim_sem = ("parallel", "arbitrary")

    out2d = pl.pallas_call(
        kernel,
        out_shape=jax.ShapeDtypeStruct((rows_p, d_model), dtype),
        grid_spec=pltpu.PrefetchScalarGridSpec(
            num_scalar_prefetch=0,
            grid=grid,
            in_specs=in_specs,
            out_specs=out_specs,
            scratch_shapes=scratch_shapes,
        ),
        compiler_params=pltpu.CompilerParams(
            dimension_semantics=dim_sem,
            vmem_limit_bytes=int(vmem_limit_bytes),
        ),
    )(x2d, w1, b1, w2, b2, gamma, beta)

    return out2d[:rows].reshape(seq, batch, d_model)


def make_params(key, d_model, d_inner, dtype=jnp.float32):
    """Deterministic init mimicking nn.Linear defaults (uniform +-1/sqrt(fan_in)).

    Weights are stored already transposed to (in_features, out_features)."""
    k1, k2, k3, k4 = jax.random.split(key, 4)
    lim1 = 1.0 / (d_model ** 0.5)
    lim2 = 1.0 / (d_inner ** 0.5)
    return {
        "w1": jax.random.uniform(k1, (d_model, d_inner), dtype, -lim1, lim1),
        "b1": jax.random.uniform(k2, (d_inner,), dtype, -lim1, lim1),
        "w2": jax.random.uniform(k3, (d_inner, d_model), dtype, -lim2, lim2),
        "b2": jax.random.uniform(k4, (d_model,), dtype, -lim2, lim2),
        "gamma": jnp.ones((d_model,), dtype),   # nn.LayerNorm weight init
        "beta": jnp.zeros((d_model,), dtype),   # nn.LayerNorm bias init
    }


def positionwise_ff_ref(inp, params, *, pre_lnorm=False, eps=1e-5):
    """Pure-JAX reference matching the PyTorch forward (eval mode)."""
    def ln(y):
        mean = jnp.mean(y, axis=-1, keepdims=True)
        var = jnp.mean((y - mean) ** 2, axis=-1, keepdims=True)
        return (y - mean) / jnp.sqrt(var + eps) * params["gamma"] + params["beta"]

    def core(y):
        h = jnp.maximum(y @ params["w1"] + params["b1"], 0.0)
        return h @ params["w2"] + params["b2"]

    if pre_lnorm:
        return core(ln(inp)) + inp
    return ln(inp + core(inp))


if __name__ == "__main__":
    key = jax.random.PRNGKey(0)
    k_x, k_p, k_x2 = jax.random.split(key, 3)

    seq, batch, d_model, d_inner = 8, 2, 128, 256
    x = jax.random.normal(k_x, (seq, batch, d_model), jnp.float32)
    params = make_params(k_p, d_model, d_inner)

    # post-lnorm (module default pre_lnorm=False), auto plan -> weight-resident path
    out = jax.block_until_ready(positionwise_ff(x, params, pre_lnorm=False))
    ref = positionwise_ff_ref(x, params, pre_lnorm=False)
    assert out.shape == x.shape
    assert jnp.allclose(out, ref, atol=1e-4, rtol=1e-4), "post-lnorm (resident) mismatch"

    # post-lnorm, forced d_inner tiling (reduction grid axis, no cin scratch)
    out_t = jax.block_until_ready(positionwise_ff(x, params, pre_lnorm=False, tile_inner=128))
    assert jnp.allclose(out_t, ref, atol=1e-4, rtol=1e-4), "post-lnorm (tiled) mismatch"

    # pre-lnorm, forced d_inner tiling (cin scratch + f32 accumulator path)
    out_pre = jax.block_until_ready(positionwise_ff(x, params, pre_lnorm=True, tile_inner=128))
    ref_pre = positionwise_ff_ref(x, params, pre_lnorm=True)
    assert jnp.allclose(out_pre, ref_pre, atol=1e-4, rtol=1e-4), "pre-lnorm mismatch"

    # ragged row count (exercises wrapper padding + >=2 row-tile split)
    x_r = jax.random.normal(k_x2, (5, 3, d_model), jnp.float32)
    out_r = jax.block_until_ready(positionwise_ff(x_r, params, pre_lnorm=False))
    ref_r = positionwise_ff_ref(x_r, params, pre_lnorm=False)
    assert jnp.allclose(out_r, ref_r, atol=1e-4, rtol=1e-4), "ragged-rows mismatch"

    # bf16 path: native bf16 MXU operands, f32 accumulation (looser tolerance)
    x_bf = x.astype(jnp.bfloat16)
    params_bf = {k: v.astype(jnp.bfloat16) for k, v in params.items()}
    out_bf = jax.block_until_ready(positionwise_ff(x_bf, params_bf, pre_lnorm=False))
    ref_bf = positionwise_ff_ref(x_bf.astype(jnp.float32),
                                 {k: v.astype(jnp.float32) for k, v in params_bf.items()},
                                 pre_lnorm=False)
    assert jnp.allclose(out_bf.astype(jnp.float32), ref_bf, atol=1e-1, rtol=1e-1), "bf16 mismatch"

    # opt-in bf16 MXU operands on f32 data (throughput/precision tradeoff)
    out_mx = jax.block_until_ready(positionwise_ff(x, params, pre_lnorm=False, mxu_bf16=True))
    assert jnp.allclose(out_mx, ref, atol=1e-1, rtol=1e-1), "mxu_bf16 mismatch"

    print("KERNEL_OK")
</pallas_src>

<mosaic_0001>
module attributes {stable_mosaic.version = 11 : i64} {
  func.func @_probe(%arg0: i32, %arg1: memref<8x128xf32, #tpu.memory_space<vmem>>, %arg2: memref<8x128xf32, #tpu.memory_space<vmem>>) attributes {dimension_semantics = [#tpu.dimension_semantics<arbitrary>], iteration_bounds = array<i64: 2>, scalar_prefetch = 0 : i64, scratch_operands = 0 : i64, tpu.core_type = #tpu.core_type<tc>, window_params = [{pipeline_mode = #tpu.pipeline_mode<synchronous>, transform_indices = @transform_0, window_bounds = array<i64: 8, 128>}, {transform_indices = @transform_1, window_bounds = array<i64: 8, 128>}]} {
    %c0 = arith.constant 0 : index
    %c0_0 = arith.constant 0 : index
    %0 = vector.load %arg1[%c0, %c0_0] : memref<8x128xf32, #tpu.memory_space<vmem>>, vector<8x128xf32>
    %cst = arith.constant 2.000000e+00 : f32
    %1 = vector.broadcast %cst : f32 to vector<8x128xf32>
    %2 = arith.mulf %0, %1 : vector<8x128xf32>
    %c0_1 = arith.constant 0 : index
    %c0_2 = arith.constant 0 : index
    %3 = vector.load %arg2[%c0_1, %c0_2] : memref<8x128xf32, #tpu.memory_space<vmem>>, vector<8x128xf32>
    tpu.vector_store %arg2[%c0_1, %c0_2], %2 {strides = array<i32>} : memref<8x128xf32, #tpu.memory_space<vmem>>, vector<8x128xf32>,
    return
  }
  func.func @transform_0(%arg0: i32) -> (i32, i32) {
    %c0_i32 = arith.constant 0 : i32
    %c0_i32_0 = arith.constant 0 : i32
    %c0_i32_1 = arith.constant 0 : i32
    return %c0_i32, %c0_i32_0 : i32, i32
  }
  func.func @transform_1(%arg0: i32) -> (i32, i32) {
    %c0_i32 = arith.constant 0 : i32
    %c0_i32_0 = arith.constant 0 : i32
    return %arg0, %c0_i32 : i32, i32
  }
}

module attributes {stable_mosaic.version = 11 : i64} {
  func.func @_ff_kernel_resident(%arg0: i32, %arg1: memref<8x128xf32, #tpu.memory_space<vmem>>, %arg2: memref<128x256xf32, #tpu.memory_space<vmem>>, %arg3: memref<1x256xf32, #tpu.memory_space<vmem>>, %arg4: memref<256x128xf32, #tpu.memory_space<vmem>>, %arg5: memref<1x128xf32, #tpu.memory_space<vmem>>, %arg6: memref<1x128xf32, #tpu.memory_space<vmem>>, %arg7: memref<1x128xf32, #tpu.memory_space<vmem>>, %arg8: memref<8x128xf32, #tpu.memory_space<vmem>>) attributes {dimension_semantics = [#tpu.dimension_semantics<parallel>], iteration_bounds = array<i64: 2>, scalar_prefetch = 0 : i64, scratch_operands = 0 : i64, tpu.core_type = #tpu.core_type<tc>, window_params = [{transform_indices = @transform_0, window_bounds = array<i64: 8, 128>}, {pipeline_mode = #tpu.pipeline_mode<synchronous>, transform_indices = @transform_1, window_bounds = array<i64: 128, 256>}, {pipeline_mode = #tpu.pipeline_mode<synchronous>, transform_indices = @transform_2, window_bounds = array<i64: 1, 256>}, {pipeline_mode = #tpu.pipeline_mode<synchronous>, transform_indices = @transform_3, window_bounds = array<i64: 256, 128>}, {pipeline_mode = #tpu.pipeline_mode<synchronous>, transform_indices = @transform_4, window_bounds = array<i64: 1, 128>}, {pipeline_mode = #tpu.pipeline_mode<synchronous>, transform_indices = @transform_5, window_bounds = array<i64: 1, 128>}, {pipeline_mode = #tpu.pipeline_mode<synchronous>, transform_indices = @transform_6, window_bounds = array<i64: 1, 128>}, {transform_indices = @transform_7, window_bounds = array<i64: 8, 128>}]} {
    %c0 = arith.constant 0 : index
    %c0_0 = arith.constant 0 : index
    %0 = vector.load %arg1[%c0, %c0_0] : memref<8x128xf32, #tpu.memory_space<vmem>>, vector<8x128xf32>
    %c0_1 = arith.constant 0 : index
    %c0_2 = arith.constant 0 : index
    %1 = vector.load %arg6[%c0_1, %c0_2] : memref<1x128xf32, #tpu.memory_space<vmem>>, vector<1x128xf32>
    %c0_3 = arith.constant 0 : index
    %c0_4 = arith.constant 0 : index
    %2 = vector.load %arg7[%c0_3, %c0_4] : memref<1x128xf32, #tpu.memory_space<vmem>>, vector<1x128xf32>
    %c0_5 = arith.constant 0 : index
    %c0_6 = arith.constant 0 : index
    %3 = vector.load %arg2[%c0_5, %c0_6] : memref<128x256xf32, #tpu.memory_space<vmem>>, vector<128x256xf32>
    %cst = arith.constant dense<0.000000e+00> : vector<8x256xf32>
    %4 = tpu.matmul %0, %3, %cst {dimension_numbers = #tpu.dot_dimension_numbers<[1], [0], [0], [1], [0, 0, 1, 1], [], []>} : vector<8x128xf32>, vector<128x256xf32>, vector<8x256xf32> -> vector<8x256xf32>
    %c0_7 = arith.constant 0 : index
    %c0_8 = arith.constant 0 : index
    %5 = vector.load %arg3[%c0_7, %c0_8] : memref<1x256xf32, #tpu.memory_space<vmem>>, vector<1x256xf32>
    %6 = vector.broadcast %5 : vector<1x256xf32> to vector<8x256xf32>
    %7 = arith.addf %4, %6 : vector<8x256xf32>
    %cst_9 = arith.constant 0.000000e+00 : f32
    %8 = vector.broadcast %cst_9 : f32 to vector<8x256xf32>
    %9 = arith.maximumf %7, %8 : vector<8x256xf32>
    %c0_10 = arith.constant 0 : index
    %c0_11 = arith.constant 0 : index
    %10 = vector.load %arg4[%c0_10, %c0_11] : memref<256x128xf32, #tpu.memory_space<vmem>>, vector<256x128xf32>
    %cst_12 = arith.constant dense<0.000000e+00> : vector<8x128xf32>
    %11 = tpu.matmul %9, %10, %cst_12 {dimension_numbers = #tpu.dot_dimension_numbers<[1], [0], [0], [1], [0, 0, 1, 1], [], []>} : vector<8x256xf32>, vector<256x128xf32>, vector<8x128xf32> -> vector<8x128xf32>
    %c0_13 = arith.constant 0 : index
    %c0_14 = arith.constant 0 : index
    %12 = vector.load %arg5[%c0_13, %c0_14] : memref<1x128xf32, #tpu.memory_space<vmem>>, vector<1x128xf32>
    %13 = vector.broadcast %12 : vector<1x128xf32> to vector<8x128xf32>
    %14 = arith.addf %11, %13 : vector<8x128xf32>
    %15 = arith.addf %0, %14 : vector<8x128xf32>
    %cst_15 = arith.constant dense<0.000000e+00> : vector<8xf32>
    %16 = vector.multi_reduction <add>, %15, %cst_15 [1] : vector<8x128xf32> to vector<8xf32>
    %17 = vector.shape_cast %16 : vector<8xf32> to vector<8x1xf32>
    %cst_16 = arith.constant 1.280000e+02 : f32
    %18 = vector.broadcast %cst_16 : f32 to vector<8x1xf32>
    %19 = arith.divf %17, %18 : vector<8x1xf32>
    %20 = vector.broadcast %19 : vector<8x1xf32> to vector<8x128xf32>
    %21 = arith.subf %15, %20 : vector<8x128xf32>
    %22 = arith.mulf %21, %21 : vector<8x128xf32>
    %cst_17 = arith.constant dense<0.000000e+00> : vector<8xf32>
    %23 = vector.multi_reduction <add>, %22, %cst_17 [1] : vector<8x128xf32> to vector<8xf32>
    %24 = vector.shape_cast %23 : vector<8xf32> to vector<8x1xf32>
    %cst_18 = arith.constant 1.280000e+02 : f32
    %25 = vector.broadcast %cst_18 : f32 to vector<8x1xf32>
    %26 = arith.divf %24, %25 : vector<8x1xf32>
    %cst_19 = arith.constant 9.99999974E-6 : f32
    %27 = vector.broadcast %cst_19 : f32 to vector<8x1xf32>
    %28 = arith.addf %26, %27 : vector<8x1xf32>
    %29 = math.rsqrt %28 : vector<8x1xf32>
    %30 = vector.broadcast %29 : vector<8x1xf32> to vector<8x128xf32>
    %31 = arith.mulf %21, %30 : vector<8x128xf32>
    %32 = vector.broadcast %1 : vector<1x128xf32> to vector<8x128xf32>
    %33 = arith.mulf %31, %32 : vector<8x128xf32>
    %34 = vector.broadcast %2 : vector<1x128xf32> to vector<8x128xf32>
    %35 = arith.addf %33, %34 : vector<8x128xf32>
    %c0_20 = arith.constant 0 : index
    %c0_21 = arith.constant 0 : index
    %36 = vector.load %arg8[%c0_20, %c0_21] : memref<8x128xf32, #tpu.memory_space<vmem>>, vector<8x128xf32>
    tpu.vector_store %arg8[%c0_20, %c0_21], %35 {strides = array<i32>} : memref<8x128xf32, #tpu.memory_space<vmem>>, vector<8x128xf32>,
    return
  }
  func.func @transform_0(%arg0: i32) -> (i32, i32) {
    %c0_i32 = arith.constant 0 : i32
    %c0_i32_0 = arith.constant 0 : i32
    return %arg0, %c0_i32 : i32, i32
  }
  func.func @transform_1(%arg0: i32) -> (i32, i32) {
    %c0_i32 = arith.constant 0 : i32
    %c0_i32_0 = arith.constant 0 : i32
    %c0_i32_1 = arith.constant 0 : i32
    return %c0_i32, %c0_i32_0 : i32, i32
  }
  func.func @transform_2(%arg0: i32) -> (i32, i32) {
    %c0_i32 = arith.constant 0 : i32
    %c0_i32_0 = arith.constant 0 : i32
    %c0_i32_1 = arith.constant 0 : i32
    return %c0_i32, %c0_i32_0 : i32, i32
  }
  func.func @transform_3(%arg0: i32) -> (i32, i32) {
    %c0_i32 = arith.constant 0 : i32
    %c0_i32_0 = arith.constant 0 : i32
    %c0_i32_1 = arith.constant 0 : i32
    return %c0_i32, %c0_i32_0 : i32, i32
  }
  func.func @transform_4(%arg0: i32) -> (i32, i32) {
    %c0_i32 = arith.constant 0 : i32
    %c0_i32_0 = arith.constant 0 : i32
    %c0_i32_1 = arith.constant 0 : i32
    return %c0_i32, %c0_i32_0 : i32, i32
  }
  func.func @transform_5(%arg0: i32) -> (i32, i32) {
    %c0_i32 = arith.constant 0 : i32
    %c0_i32_0 = arith.constant 0 : i32
    %c0_i32_1 = arith.constant 0 : i32
    return %c0_i32, %c0_i32_0 : i32, i32
  }
  func.func @transform_6(%arg0: i32) -> (i32, i32) {
    %c0_i32 = arith.constant 0 : i32
    %c0_i32_0 = arith.constant 0 : i32
    %c0_i32_1 = arith.constant 0 : i32
    return %c0_i32, %c0_i32_0 : i32, i32
  }
  func.func @transform_7(%arg0: i32) -> (i32, i32) {
    %c0_i32 = arith.constant 0 : i32
    %c0_i32_0 = arith.constant 0 : i32
    return %arg0, %c0_i32 : i32, i32
  }
}

</mosaic_0001>

<bundles_post_ra>
// kernel: tpu_custom_call.1
= control target key start
LH: loop header
LB: loop body
LE: loop exit
PB: predicated region body
PF: predicated region fallthrough
CT: control target
= control target key end

     0   :  { %6 = vsyncpa [#allocation3], 0  ;;  %s441_s0 = inlined_call_operand.hbm [shape: f32[8,128], index: 0, kind: input, shape index: {}]   ;;  %s442_s1 = inlined_call_operand.hbm [shape: f32[16,128], index: 1, kind: output, shape index: {}]  }
   0x1   :  { %7 = vsyncpa [#allocation4], 0 }
   0x2   :  { %9 = vsyncpa [#allocation4 + $0x1], 0  ;;  %s357_s6 = smov 0   ;;  %s359_s7 = smov 0  }
   0x3   :  { %s361_s8 = smov 0   ;;  %s363_s9 = smov 0  }
   0x4 LB: > { %s378_s10 = sadd.s32 4294967295, %s344_s9   ;;  %s188_s11 = sadd.s32 4294967294, %s344_s9   ;;  %s344_s9 = sphi %s363_s9, %s448_s9   ;;  %s340_s8 = sphi %s361_s8, %s447_s8   ;;  %s336_s7 = sphi %s359_s7, %s446_s7   ;;  %s332_s6 = sphi %s357_s6, %s445_s6  }
   0x5   : > { %s382_s12 = sadd.s32 1, %s344_s9   ;;  %s43_s13 = sadd.s32 1, %s340_s8 }
   0x6   : > { %s40_s14 = ssub.s32 %s344_s9, %s382_s12  ;;  %p53_p0 = scmp.ne.s32.totalorder %s340_s8, %s336_s7 }
   0x7   : > { %p41_p1 = scmp.eq.s32.totalorder %s40_s14, 0  ;;  %p54_p2 = scmp.eq.s32.totalorder %s378_s10, 1 }
   0x8   : > { %p59_p3 = scmp.ne.s32.totalorder %s336_s7, %s332_s6  ;;  %p60_p4 = scmp.eq.s32.totalorder %s188_s11, 1 }
   0x9   : > { %s393_s15 = scalar_select %p41_p1, %s340_s8, %s43_s13  }
   0xa   : > { %p395_p5 = por %p54_p2, %p53_p0  ;;  %p399_p6 = por %p60_p4, %p59_p3 }
   0xb   : > { %p189_p7 = scmp.ge.s32.totalorder %s344_s9, 1  ;;  %p67_p8 = scmp.lt.s32.totalorder %s344_s9, 3 }
   0xc   : > { %p212_p9 = scmp.eq.s32.totalorder %s378_s10, 0  ;;  %s79_s20 = sshll.u32 %s441_s0, 4  ;;  %s80_s20 = int_to_ptr.hbm [resolvable:$true] %s79_s20 }
   0xd   : > { %p68_p10 = pnand %p189_p7, %p67_p8  ;;  %s346_s21 = smov [#allocation2]  }
   0xe   : > { %s81_s22 = sshll.u32 %s346_s21, 4  ;;  %s82_s22 = int_to_ptr.vmem [resolvable:$true] %s81_s22 }
   0xf   : > { %p204_p11 = pneg %p68_p10  ;;  %94 = sbr.rel (%p68_p10) target bundleno = 37 (0x25), region = 24 }
  0x11   : > { %p205_p12 = pnand %p212_p9, %p204_p11 }
  0x13   : > { %207 = dma.hbm_to_vmem [thread:$0]  (!%p205_p12), %s80_s20, 128, %s82_s22, [#allocation3]  }
  0x14   : > { %323 = dma.done.wait (%p212_p9), [#allocation3], 128  }
  0x15   : > { %325 = vsyncadd (%p212_p9), [#allocation3], 4294967168  ;;  %s107_s23 = sand.u32 1, %s336_s7   ;;  %s195_s24 = sshll.u32 %s378_s10, 3  ;;  %v110_v0 = vld [vmem:[#allocation2] sm:$0xff] }
  0x16   : > { %s193_s25 = sshll.u32 %s107_s23, 3  ;;  %s124_s28 = scalar_lea.hbm %s442_s1, %s195_s24  ;;  %v111_v1 = vmul.f32 2.0, %v110_v0 }
  0x17   : > { %s109_s29 = scalar_lea.vmem [#allocation5], %s193_s25  ;;  %s128_s2 = sshll.u32 %s124_s28, 4  ;;  %s129_s2 = int_to_ptr.hbm [resolvable:$true] %s128_s2 }
  0x18   : > { %s126_s30 = sshll.u32 %s109_s29, 4  ;;  %112 = vst [vmem:[%s109_s29] sm:$0xff] %v111_v1  ;;  %s114_s3 = scalar_lea.sflag [#allocation4], %s107_s23  ;;  %s127_s30 = int_to_ptr.vmem [resolvable:$true] %s126_s30 }
  0x19   : > { %s292_s4 = sshra.s32 %s129_s2, 4  ;;  %s298_s13 = scalar_lea.hbm %s442_s1, 16  ;;  %s293_s4 = int_to_ptr.hbm [resolvable:$true] %s292_s4 }
  0x1a   : > { %s294_s5 = scalar_lea.hbm %s293_s4, 8  ;;  %p299_p2 = scmp.lt.s32.totalorder %s293_s4, %s442_s1 }
  0x1b   : > { %p295_p13 = scmp.ne.s32.totalorder %s293_s4, %s294_s5  ;;  %p300_p3 = scmp.lt.s32.totalorder %s298_s13, %s294_s5 }
  0x1d   : > { %p296_p0 = pnand %p295_p13, %p395_p5  ;;  %p301_p4 = por %p300_p3, %p299_p2 }
  0x1f   : > { %p297_p1 = pneg %p296_p0 }
  0x21   : > { %p302_p7 = pnand %p301_p4, %p297_p1 }
  0x23   : > { %305 = shalt.err (!%p302_p7)
}
  0x24   : > { %202 = dma.vmem_to_hbm [thread:$0]  (%p395_p5), %s127_s30, 128, %s129_s2, %s114_s3  }
  0x25 PF: > { %p214_p8 = scmp.ge.s32.totalorder %s344_s9, 2  ;;  %s140_s19 = sand.u32 1, %s332_s6  }
  0x26   : > { %s141_s20 = scalar_lea.sflag [#allocation4], %s140_s19 }
  0x27   : > { %p209_p9 = pnand %p214_p8, %p399_p6 }
  0x29   : > { %p210_p10 = pneg %p209_p9 }
  0x2b   : > { %327 = dma.done.wait (%p210_p10), %s141_s20, 128  }
  0x2c   : > { %329 = vsyncadd (%p210_p10), %s141_s20, 4294967168  ;;  %p12_p11 = scmp.ge.s32.totalorder %s382_s12, 4   ;;  %s445_s6 = smov %s336_s7 }
  0x2d   : > { %s446_s7 = smov %s340_s8  ;;  %s447_s8 = smov %s393_s15 }
  0x2e   : > { %s448_s9 = smov %s382_s12  ;;  %14 = sbr.rel (!%p12_p11) target bundleno = 4 (0x4), region = 61 }
  0x33   :  { %147 = vsyncpa [#allocation3], 1 }
  0x34   :  { %149 = vsyncpa [#allocation3 + $0x1], 1 }
  0x35   :  { %150 = vsyncpa [#allocation4], 1 }
  0x36   :  { %152 = vsyncpa [#allocation4 + $0x1], 1 }

// kernel: tpu_custom_call.1
= control target key start
LH: loop header
LB: loop body
LE: loop exit
PB: predicated region body
PF: predicated region fallthrough
CT: control target
= control target key end

     0   :  { %s1178_s0 = inlined_call_operand.hbm [shape: f32[16,128], index: 0, kind: input, shape index: {}]   ;;  %s1179_s1 = inlined_call_operand.hbm [shape: f32[128,256], index: 1, kind: input, shape index: {}]   ;;  %s1180_s2 = inlined_call_operand.hbm [shape: f32[1,256], index: 2, kind: input, shape index: {}]   ;;  %s1181_s3 = inlined_call_operand.hbm [shape: f32[256,128], index: 3, kind: input, shape index: {}]   ;;  %s1182_s4 = inlined_call_operand.vmem [shape: f32[1,128], index: 4, kind: input, shape index: {}]   ;;  %s1183_s5 = inlined_call_operand.vmem [shape: f32[1,128], index: 5, kind: input, shape index: {}]   ;;  %s1184_s6 = inlined_call_operand.vmem [shape: f32[1,128], index: 6, kind: input, shape index: {}]   ;;  %s1185_s7 = inlined_call_operand.hbm [shape: f32[16,128], index: 7, kind: output, shape index: {}]  }
   0x1   :  { %1186 = sst [smem:[#allocation15_spill]] %s1179_s1 }
   0x2   :  { %12 = vsyncpa [#allocation3], 0 }
   0x3   :  { %14 = vsyncpa [#allocation3 + $0x1], 0 }
   0x4   :  { %15 = vsyncpa [#allocation6], 0 }
   0x5   :  { %16 = vsyncpa [#allocation9], 0 }
   0x6   :  { %17 = vsyncpa [#allocation4], 0 }
   0x7   :  { %19 = vsyncpa [#allocation4 + $0x1], 0  ;;  %s1006_s24 = smov 0   ;;  %s1008_s25 = smov 0  }
   0x8   :  { %s1010_s26 = smov 0   ;;  %s1012_s27 = smov 0  }
   0x9 LB: > { %s1187_s1 = sld [smem:[#allocation15_spill]]  ;;  %s1030_s8 = sadd.s32 4294967295, %s956_s27   ;;  %s956_s27 = sphi %s1012_s27, %s1198_s27   ;;  %s952_s26 = sphi %s1010_s26, %s1197_s26   ;;  %s948_s25 = sphi %s1008_s25, %s1196_s25   ;;  %s944_s24 = sphi %s1006_s24, %s1195_s24  }
   0xa   : > { %p656_p0 = scmp.ge.s32.totalorder %s956_s27, 1  ;;  %p46_p1 = scmp.eq.s32.totalorder %s1030_s8, 0 }
   0xb   : > { %p208_p2 = scmp.lt.s32.totalorder %s956_s27, 3  ;;  %s958_s10 = smov [#allocation5]  }
   0xc   : > { %s221_s11 = sshll.u32 %s958_s10, 4  ;;  %s234_s14 = sshll.u32 %s1180_s2, 4  ;;  %s222_s11 = int_to_ptr.vmem [resolvable:$true] %s221_s11  ;;  %s235_s14 = int_to_ptr.hbm [resolvable:$true] %s234_s14 }
   0xd   : > { %p1035_p3 = pnand %p656_p0, %p208_p2  ;;  %s245_s18 = sshll.u32 %s1181_s3, 4  ;;  %s246_s18 = int_to_ptr.hbm [resolvable:$true] %s245_s18 }
   0xe   : > { %s959_s19 = smov [#allocation7]   ;;  %s960_s21 = smov 256  }
   0xf   : > { %s219_s30 = sshll.u32 %s1187_s1, 4  ;;  %p689_p4 = pneg %p1035_p3  ;;  %s220_s30 = int_to_ptr.hbm [resolvable:$true] %s219_s30 }
  0x10   : > { %s236_s20 = sshll.u32 %s959_s19, 4  ;;  %s961_s22 = smov 16   ;;  %s237_s20 = int_to_ptr.vmem [resolvable:$true] %s236_s20 }
  0x11   : > { %p1047_p6 = pnand %p689_p4, %p46_p1  ;;  %s962_s23 = smov [#allocation8]  }
  0x12   : > { %s247_s28 = sshll.u32 %s962_s23, 4  ;;  %s963_s29 = smov 128   ;;  %s248_s28 = int_to_ptr.vmem [resolvable:$true] %s247_s28 }
  0x13   : > { %692 = dma.hbm_to_vmem [thread:$0]  (!%p1047_p6), %s220_s30, 4096, %s222_s11, [#allocation6], %s960_s21, %s960_s21, %s961_s22  }
  0x14   : > { %695 = dma.hbm_to_vmem [thread:$0]  (!%p1047_p6), %s235_s14, 32, %s237_s20, [#allocation6]  }
  0x15   : > { %s964_s10 = smov 8   ;;  %s655_s12 = sadd.s32 4294967294, %s956_s27  }
  0x16   : > { %698 = dma.hbm_to_vmem [thread:$0]  (!%p1047_p6), %s246_s18, 4096, %s248_s28, [#allocation9], %s963_s29, %s963_s29, %s964_s10  }
  0x17   : > { %s1062_s30 = sadd.s32 1, %s956_s27   ;;  %s32_s11 = sadd.s32 1, %s952_s26 }
  0x18   : > { %s29_s13 = ssub.s32 %s956_s27, %s1062_s30  ;;  %p39_p7 = scmp.ne.s32.totalorder %s952_s26, %s948_s25 }
  0x19   : > { %p30_p8 = scmp.eq.s32.totalorder %s29_s13, 0  ;;  %p40_p9 = scmp.eq.s32.totalorder %s956_s27, 0 }
  0x1a   : > { %p45_p10 = scmp.ne.s32.totalorder %s948_s25, %s944_s24  ;;  %p195_p11 = scmp.eq.s32.totalorder %s1030_s8, 1 }
  0x1b   : > { %s1074_s14 = scalar_select %p30_p8, %s952_s26, %s32_s11  }
  0x1c   : > { %p1078_p12 = por %p46_p1, %p45_p10  ;;  %p1082_p13 = por %p195_p11, %p39_p7 }
  0x1d   : > { %p201_p0 = scmp.eq.s32.totalorder %s655_s12, 1  ;;  %p41_p2 = por %p40_p9, %p39_p7 }
  0x1e   : > { %s270_s17 = sand.u32 1, %s952_s26   ;;  %p710_p6 = scmp.lt.s32.totalorder %s956_s27, 2 }
  0x1f   : > { %p1087_p4 = por %p201_p0, %p45_p10  ;;  %s661_s19 = sshll.u32 %s270_s17, 3 }
  0x20   : > { %s662_s20 = sshll.u32 %s956_s27, 3  ;;  %s274_s29 = scalar_lea.vmem [#allocation2], %s661_s19 }
  0x21   : > { %s278_s23 = scalar_lea.hbm %s1178_s0, %s662_s20  ;;  %s282_s10 = sshll.u32 %s274_s29, 4  ;;  %s283_s10 = int_to_ptr.vmem [resolvable:$true] %s282_s10 }
  0x22   : > { %s280_s28 = sshll.u32 %s278_s23, 4  ;;  %p1096_p8 = pnand %p710_p6, %p41_p2  ;;  %s281_s28 = int_to_ptr.hbm [resolvable:$true] %s280_s28 }
  0x23   : > { %s271_s11 = scalar_lea.sflag [#allocation3], %s270_s17  ;;  %s852_s13 = sshra.s32 %s281_s28, 4  ;;  %s853_s13 = int_to_ptr.hbm [resolvable:$true] %s852_s13 }
  0x24   : > { %s854_s1 = scalar_lea.hbm %s853_s13, 8  ;;  %p856_p9 = pneg %p1096_p8 }
  0x25   : > { %p855_p7 = scmp.ne.s32.totalorder %s853_s13, %s854_s1  ;;  %s859_s19 = scalar_lea.hbm %s1178_s0, 16 }
  0x26   : > { %p860_p0 = scmp.lt.s32.totalorder %s853_s13, %s1178_s0  ;;  %p861_p2 = scmp.lt.s32.totalorder %s859_s19, %s854_s1 }
  0x27   : > { %p857_p10 = pnand %p856_p9, %p855_p7 }
  0x28   : > { %p862_p6 = por %p861_p2, %p860_p0 }
  0x29   : > { %p858_p11 = pneg %p857_p10 }
  0x2b   : > { %p863_p5 = pnand %p862_p6, %p858_p11 }
  0x2d   : > { %866 = shalt.err (!%p863_p5)
}
  0x2e   : > { %702 = dma.hbm_to_vmem [thread:$0]  (!%p1096_p8), %s281_s28, 128, %s283_s10, %s271_s11  }
  0x2f   : > { %291 = sbr.rel (%p1035_p3) target bundleno = 626 (0x272), region = 48  ;;  %s1113_s17 = sand.u32 (!%p1035_p3), 1, %s948_s25  }
  0x30   : > { %s664_s29 = sshll.u32 (!%p1035_p3), %s1113_s17, 3  ;;  %s294_s20 = scalar_lea.sflag (!%p1035_p3), [#allocation3], %s1113_s17 }
  0x31   : > { %s1119_s1 = scalar_lea.vmem (!%p1035_p3), [#allocation2], %s664_s29 }
  0x34   : > { %927 = dma.done.wait (%p1078_p12), %s294_s20, 128  }
  0x35   : > { %929 = vsyncadd (%p1078_p12), %s294_s20, 4294967168 }
  0x36   : > { %931 = dma.done.wait (%p46_p1), [#allocation6], 4128  }
  0x37   : > { %933 = vsyncadd (%p46_p1), [#allocation6], 4294963168 }
  0x38   : > { %935 = dma.done.wait (%p46_p1), [#allocation9], 4096  }
  0x39   : > { %937 = vsyncadd (%p46_p1), [#allocation9], 4294963200  ;;  %v377_v0 = vld [vmem:[#allocation5 + $0xf0] sm:$0xff]  ;;  %v375_v1 = vld [vmem:[#allocation5 + $0xe0] sm:$0xff]  ;;  %s670_s28 = sshll.u32 %s1030_s8, 3  ;;  %s343_s8 = scalar_lea.vmem [#allocation10], %s664_s29 }
  0x3a   : > { %v378_v2 = vld [vmem:[#allocation5 + $0xf8] sm:$0xff]  ;;  %385 = vmatpush.msra.mxu0 %v377_v0  ;;  %v376_v3 = vld [vmem:[#allocation5 + $0xe8] sm:$0xff]  ;;  %v373_v4 = vld [vmem:[#allocation5 + $0xd0] sm:$0xff]  ;;  %s551_s21 = scalar_lea.hbm %s1185_s7, %s670_s28  ;;  %s553_s23 = sshll.u32 %s343_s8, 4  ;;  %s554_s23 = int_to_ptr.vmem [resolvable:$true] %s553_s23 }
  0x3b   : > { %405 = vmatpush.msra.mxu1 %v378_v2  ;;  %v374_v5 = vld [vmem:[#allocation5 + $0xd8] sm:$0xff]  ;;  %v371_v6 = vld [vmem:[#allocation5 + $0xc0] sm:$0xff]  ;;  %v372_v7 = vld [vmem:[#allocation5 + $0xc8] sm:$0xff]  ;;  %s555_s20 = sshll.u32 %s551_s21, 4  ;;  %s902_s12 = scalar_lea.hbm %s1185_s7, 16  ;;  %s556_s20 = int_to_ptr.hbm [resolvable:$true] %s555_s20 }
  0x3c   : > { %386 = vmatpush.msra.mxu0 %v375_v1  ;;  %v369_v8 = vld [vmem:[#allocation5 + $0xb0] sm:$0xff]  ;;  %v370_v9 = vld [vmem:[#allocation5 + $0xb8] sm:$0xff]  ;;  %v367_v10 = vld [vmem:[#allocation5 + $0xa0] sm:$0xff]  ;;  %s896_s9 = sshra.s32 %s556_s20, 4  ;;  %s897_s9 = int_to_ptr.hbm [resolvable:$true] %s896_s9 }
  0x3d   : > { %406 = vmatpush.msra.mxu1 %v376_v3  ;;  %v368_v11 = vld [vmem:[#allocation5 + $0xa8] sm:$0xff]  ;;  %v365_v12 = vld [vmem:[#allocation5 + $0x90] sm:$0xff]  ;;  %v366_v13 = vld [vmem:[#allocation5 + $0x98] sm:$0xff]  ;;  %s898_s15 = scalar_lea.hbm %s897_s9, 8  ;;  %p903_p12 = scmp.lt.s32.totalorder %s897_s9, %s1185_s7 }
  0x3e   : > { %387 = vmatpush.msra.mxu0 %v373_v4  ;;  %v442_v14 = vld [vmem:[#allocation8 + $0x78] sm:$0xff]  ;;  %v441_v15 = vld [vmem:[#allocation8 + $0x70] sm:$0xff]  ;;  %v364_v18 = vld [vmem:[#allocation5 + $0x88] sm:$0xff]  ;;  %p899_p1 = scmp.ne.s32.totalorder %s897_s9, %s898_s15  ;;  %p904_p8 = scmp.lt.s32.totalorder %s902_s12, %s898_s15 }
  0x3f   : > { %407 = vmatpush.msra.mxu1 %v374_v5  ;;  %v458_v16 = vld [vmem:[#allocation8 + $0xf8] sm:$0xff]  ;;  %463 = vmatpush.msra.mxu2 %v442_v14  ;;  %v457_v19 = vld [vmem:[#allocation8 + $0xf0] sm:$0xff]  ;;  %v440_v20 = vld [vmem:[#allocation8 + $0x68] sm:$0xff] }
  0x40   : > { %388 = vmatpush.msra.mxu0 %v371_v6  ;;  %v363_v17 = vld [vmem:[#allocation5 + $0x80] sm:$0xff]  ;;  %483 = vmatpush.msra.mxu3 %v458_v16  ;;  %v456_v21 = vld [vmem:[#allocation8 + $0xe8] sm:$0xff]  ;;  %v362_v23 = vld [vmem:[#allocation5 + $0x78] sm:$0xff]  ;;  %v965_v16 = vmov 128.0   ;;  %p900_p3 = pnand %p899_p1, %p1082_p13  ;;  %p905_p7 = por %p904_p8, %p903_p12 }
  0x41   : > { %408 = vmatpush.msra.mxu1 %v372_v7  ;;  %v361_v22 = vld [vmem:[#allocation5 + $0x70] sm:$0xff]  ;;  %464 = vmatpush.msra.mxu2 %v441_v15  ;;  %v439_v24 = vld [vmem:[#allocation8 + $0x60] sm:$0xff]  ;;  %v438_v28 = vld [vmem:[#allocation8 + $0x58] sm:$0xff]  ;;  %758 = vrcp.f32 %v965_v16 }
  0x42   : > { %389 = vmatpush.msra.mxu0 %v369_v8  ;;  %484 = vmatpush.msra.mxu3 %v457_v19  ;;  %v455_v25 = vld [vmem:[#allocation8 + $0xe0] sm:$0xff]  ;;  %v454_v29 = vld [vmem:[#allocation8 + $0xd8] sm:$0xff]  ;;  %v357_v30 = vld [vmem:[#allocation5 + $0x50] sm:$0xff]  ;;  %p901_p5 = pneg %p900_p3 }
  0x43   : > { %409 = vmatpush.msra.mxu1 %v370_v9  ;;  %v359_v26 = vld [vmem:[#allocation5 + $0x60] sm:$0xff]  ;;  %v360_v27 = vld [vmem:[#allocation5 + $0x68] sm:$0xff]  ;;  %465 = vmatpush.msra.mxu2 %v440_v20  ;;  %v358_v32 = vld [vmem:[#allocation5 + $0x58] sm:$0xff] }
  0x44   : > { %390 = vmatpush.msra.mxu0 %v367_v10  ;;  %485 = vmatpush.msra.mxu3 %v456_v21  ;;  %v355_v31 = vld [vmem:[#allocation5 + $0x40] sm:$0xff]  ;;  %v437_v33 = vld [vmem:[#allocation8 + $0x50] sm:$0xff]  ;;  %v356_v35 = vld [vmem:[#allocation5 + $0x48] sm:$0xff]  ;;  %p906_p9 = pnand %p905_p7, %p901_p5 }
  0x45   : > { %410 = vmatpush.msra.mxu1 %v368_v11  ;;  %466 = vmatpush.msra.mxu2 %v439_v24  ;;  %v453_v34 = vld [vmem:[#allocation8 + $0xd0] sm:$0xff]  ;;  %v436_v36 = vld [vmem:[#allocation8 + $0x48] sm:$0xff]  ;;  %v435_v40 = vld [vmem:[#allocation8 + $0x40] sm:$0xff] }
  0x46   : > { %391 = vmatpush.msra.mxu0 %v365_v12  ;;  %486 = vmatpush.msra.mxu3 %v455_v25  ;;  %v452_v37 = vld [vmem:[#allocation8 + $0xc8] sm:$0xff]  ;;  %v354_v39 = vld [vmem:[#allocation5 + $0x38] sm:$0xff]  ;;  %v451_v41 = vld [vmem:[#allocation8 + $0xc0] sm:$0xff] }
  0x47   : > { %411 = vmatpush.msra.mxu1 %v366_v13  ;;  %467 = vmatpush.msra.mxu2 %v438_v28  ;;  %v353_v38 = vld [vmem:[#allocation5 + $0x30] sm:$0xff]  ;;  %v351_v42 = vld [vmem:[#allocation5 + $0x20] sm:$0xff]  ;;  %v352_v43 = vld [vmem:[#allocation5 + $0x28] sm:$0xff] }
  0x48   : > { %392 = vmatpush.msra.mxu0 %v363_v17  ;;  %487 = vmatpush.msra.mxu3 %v454_v29  ;;  %v434_v44 = vld [vmem:[#allocation8 + $0x38] sm:$0xff]  ;;  %v349_v46 = vld [vmem:[#allocation5 + $0x10] sm:$0xff]  ;;  %v348_v51 = vld [vmem:[#allocation5 + $0x8] sm:$0xff]  ;;  %v759_v17 = vpop.eup %758 }
  0x49   : > { %412 = vmatpush.msra.mxu1 %v364_v18  ;;  %468 = vmatpush.msra.mxu2 %v437_v33  ;;  %v450_v45 = vld [vmem:[#allocation8 + $0xb8] sm:$0xff]  ;;  %v433_v48 = vld [vmem:[#allocation8 + $0x30] sm:$0xff]  ;;  %v432_v53 = vld [vmem:[#allocation8 + $0x28] sm:$0xff]  ;;  %v507_v18 = vmul.f32 128.0, %v759_v17  ;;  %vm511_vm0 = vweird.f32 %v759_v17 }
  0x4a   : > { %393 = vmatpush.msra.mxu0 %v361_v22  ;;  %488 = vmatpush.msra.mxu3 %v453_v34  ;;  %v350_v47 = vld [vmem:[#allocation5 + $0x18] sm:$0xff]  ;;  %v347_v50 = vld [vmem:[#allocation5] sm:$0xff]  ;;  %v448_v54 = vld [vmem:[#allocation8 + $0xa8] sm:$0xff] }
  0x4b   : > { %413 = vmatpush.msra.mxu1 %v362_v23  ;;  %469 = vmatpush.msra.mxu2 %v436_v36  ;;  %v449_v49 = vld [vmem:[#allocation8 + $0xb0] sm:$0xff]  ;;  %v431_v55 = vld [vmem:[#allocation8 + $0x20] sm:$0xff]  ;;  %v430_v57 = vld [vmem:[#allocation8 + $0x18] sm:$0xff]  ;;  %v508_v19 = vsub.f32 1.0, %v507_v18 }
  0x4c   : > { %394 = vmatpush.msra.mxu0 %v359_v26  ;;  %489 = vmatpush.msra.mxu3 %v452_v37  ;;  %v344_v52 = vld [vmem:[%s1119_s1] sm:$0xff]  ;;  %v447_v56 = vld [vmem:[#allocation8 + $0xa0] sm:$0xff]  ;;  %v379_v1 = vld [vmem:[#allocation7] sm:$0x3]  ;;  %s541_s1 = scalar_lea.sflag [#allocation4], %s1113_s17 }
  0x4d   : > { %414 = vmatpush.msra.mxu1 %v360_v27  ;;  %470 = vmatpush.msra.mxu2 %v435_v40  ;;  %v429_v58 = vld [vmem:[#allocation8 + $0x10] sm:$0xff]  ;;  %v446_v59 = vld [vmem:[#allocation8 + $0x98] sm:$0xff]  ;;  %v428_v60 = vld [vmem:[#allocation8 + $0x8] sm:$0xff]  ;;  %v381_v2 = vperm.slane %v379_v1, 0  ;;  %v382_v3 = vperm.slane %v379_v1, 1  ;;  %v509_v20 = vmul.f32 %v759_v17, %v508_v19 }
  0x4e   : > { %395 = vmatpush.msra.mxu0 %v357_v30  ;;  %490 = vmatpush.msra.mxu3 %v451_v41  ;;  %v445_v61 = vld [vmem:[#allocation8 + $0x90] sm:$0xff]  ;;  %v427_v62 = vld [vmem:[#allocation8] sm:$0xff]  ;;  %v444_v63 = vld [vmem:[#allocation8 + $0x88] sm:$0xff] }
  0x4f   : > { %415 = vmatpush.msra.mxu1 %v358_v32  ;;  %471 = vmatpush.msra.mxu2 %v434_v44  ;;  %v443_v0 = vld [vmem:[#allocation8 + $0x80] sm:$0xff]  ;;  %v755_v10 = vld [vmem:[%s1182_s4] ss:$0 sm:$0xff]  ;;  %v510_v21 = vadd.f32 %v759_v17, %v509_v20 }
  0x50   : > { %396 = vmatpush.msra.mxu0 %v355_v31  ;;  %491 = vmatpush.msra.mxu3 %v450_v45  ;;  %v756_v36 = vld [vmem:[%s1183_s5] ss:$0 sm:$0xff] }
  0x51   : > { %416 = vmatpush.msra.mxu1 %v356_v35  ;;  %472 = vmatpush.msra.mxu2 %v433_v48  ;;  %v512_v22 = vsel %vm511_vm0, %v759_v17, %v510_v21 }
  0x52   : > { %397 = vmatpush.msra.mxu0 %v353_v38  ;;  %492 = vmatpush.msra.mxu3 %v449_v49 }
  0x53   : > { %417 = vmatpush.msra.mxu1 %v354_v39  ;;  %473 = vmatpush.msra.mxu2 %v432_v53  ;;  %v757_v39 = vld [vmem:[%s1184_s6] ss:$0 sm:$0xff] }
  0x54   : > { %398 = vmatpush.msra.mxu0 %v351_v42  ;;  %493 = vmatpush.msra.mxu3 %v448_v54 }
  0x55   : > { %418 = vmatpush.msra.mxu1 %v352_v43  ;;  %474 = vmatpush.msra.mxu2 %v431_v55 }
  0x56   : > { %399 = vmatpush.msra.mxu0 %v349_v46  ;;  %494 = vmatpush.msra.mxu3 %v447_v56 }
  0x57   : > { %419 = vmatpush.msra.mxu1 %v350_v47  ;;  %475 = vmatpush.msra.mxu2 %v430_v57 }
  0x58   : > { %400 = vmatpush.msra.mxu0 %v347_v50  ;;  %495 = vmatpush.msra.mxu3 %v446_v59 }
  0x59   : > { %420 = vmatpush.msra.mxu1 %v348_v51  ;;  %401 = vmatmul.f32.vlgmr.msra.gmra.mxu0 %v344_v52 }
  0x5a   : > { %421 = vmatmul.f32.vlgmr.msra.gmra.mxu1 %v344_v52  ;;  %476 = vmatpush.msra.mxu2 %v429_v58 }
  0x5b   : > { %496 = vmatpush.msra.mxu3 %v445_v61 }
  0x5c   : > { %477 = vmatpush.msra.mxu2 %v428_v60 }
  0x5d   : > { %497 = vmatpush.msra.mxu3 %v444_v63 }
  0x5e   : > { %478 = vmatpush.msra.mxu2 %v427_v62 }
  0x5f   : > { %498 = vmatpush.msra.mxu3 %v443_v0 }
  0xd6   : > { %v402_v4 = vpop.f32.mrf.mxu0 }
  0xd7   : > { %v422_v5 = vpop.f32.mrf.mxu1  ;;  %v403_v6 = vadd.f32 %v402_v4, %v381_v2 }
  0xd8   : > { %v423_v7 = vadd.f32 %v422_v5, %v382_v3 }
  0xd9   : > { %v425_v8 = vmax.f32 %v403_v6, 0.0 }
  0xda   : > { %v426_v9 = vmax.f32 %v423_v7, 0.0 }
  0xdb   : > { %479 = vmatmul.f32.vlgmr.msra.gmra.mxu2 %v425_v8 }
  0xdc   : > { %499 = vmatmul.f32.vlgmr.msra.gmra.mxu3 %v426_v9 }
 0x15e   : > { %v480_v11 = vpop.f32.mrf.mxu2 }
 0x15f   : > { %v500_v12 = vpop.f32.mrf.mxu3  ;;  %v481_v13 = vadd.f32 %v755_v10, %v480_v11 }
 0x161   : > { %v501_v14 = vadd.f32 %v500_v12, %v481_v13 }
 0x163   : > { %v503_v15 = vadd.f32 %v501_v14, %v344_v52 }
 0x165   : > { %504 = vadd.xlane.f32.xlu0 %v503_v15 }
 0x1d8   : > { %v505_v23 = vpop.xlane.xlu0 %504 }
 0x1d9   : > { %v513_v24 = vmul.f32 %v512_v22, %v505_v23 }
 0x1db   : > { %v514_v25 = vsub.f32 %v503_v15, %v513_v24 }
 0x1dd   : > { %v515_v26 = vmul.f32 %v514_v25, %v514_v25 }
 0x1df   : > { %516 = vadd.xlane.f32.xlu0 %v515_v26 }
 0x252   : > { %v517_v27 = vpop.xlane.xlu0 %516 }
 0x253   : > { %v518_v28 = vmul.f32 %v517_v27, %v512_v22 }
 0x255   : > { %v519_v29 = vadd.f32 1e-05, %v518_v28 }
 0x257   : > { %760 = vrsqrt.f32 %v519_v29  ;;  %vm526_vm2 = vweird.f32 %v519_v29 }
 0x25d   : > { %v761_v30 = vpop.eup %760 }
 0x25e   : > { %v521_v31 = vmul.f32 %v761_v30, %v519_v29  ;;  %vm527_vm1 = vweird.f32 %v761_v30 }
 0x25f   : > { %vm528_vm3 = vmor %vm526_vm2, %vm527_vm1 }
 0x260   : > { %v522_v32 = vmul.f32 %v761_v30, %v521_v31 }
 0x262   : > { %v523_v33 = vmul.f32 0.5, %v522_v32 }
 0x264   : > { %v524_v34 = vsub.f32 1.5, %v523_v33 }
 0x266   : > { %v525_v35 = vmul.f32 %v761_v30, %v524_v34 }
 0x268   : > { %v529_v37 = vsel %vm528_vm3, %v761_v30, %v525_v35 }
 0x269   : > { %v530_v38 = vmul.f32 %v529_v37, %v514_v25 }
 0x26b   : > { %v534_v40 = vmul.f32 %v756_v36, %v530_v38 }
 0x26d   : > { %v538_v41 = vadd.f32 %v757_v39, %v534_v40 }
 0x26f   : > { %539 = vst [vmem:[%s343_s8] sm:$0xff] %v538_v41 }
 0x270   : > { %909 = shalt.err (!%p906_p9)
}
 0x271   : > { %687 = dma.vmem_to_hbm [thread:$0]  (%p1082_p13), %s554_s23, 128, %s556_s20, %s541_s1  }
 0x272 PF: > { %s567_s17 = sand.u32 1, %s944_s24   ;;  %p1194_p10 = scmp.ge.s32.totalorder %s956_s27, 2 }
 0x273   : > { %s568_s13 = scalar_lea.sflag [#allocation4], %s567_s17 }
 0x274   : > { %p704_p11 = pnand %p1194_p10, %p1087_p4 }
 0x276   : > { %p705_p0 = pneg %p704_p11 }
 0x278   : > { %939 = dma.done.wait (%p705_p0), %s568_s13, 128  }
 0x279   : > { %941 = vsyncadd (%p705_p0), %s568_s13, 4294967168  ;;  %p22_p2 = scmp.ge.s32.totalorder %s1062_s30, 4   ;;  %s1195_s24 = smov %s948_s25 }
 0x27a   : > { %s1196_s25 = smov %s952_s26  ;;  %s1197_s26 = smov %s1074_s14 }
 0x27b   : > { %s1198_s27 = smov %s1062_s30  ;;  %24 = sbr.rel (!%p22_p2) target bundleno = 9 (0x9), region = 105 }
 0x280   :  { %574 = vsyncpa [#allocation3], 1 }
 0x281   :  { %576 = vsyncpa [#allocation3 + $0x1], 1 }
 0x282   :  { %577 = vsyncpa [#allocation6], 1 }
 0x283   :  { %578 = vsyncpa [#allocation9], 1 }
 0x284   :  { %579 = vsyncpa [#allocation4], 1 }
 0x285   :  { %581 = vsyncpa [#allocation4 + $0x1], 1 }

</bundles_post_ra>
